<compile_context>
chip_gen: v5e
topology: v5e:2x2
jax: 0.10.0
libtpu: 0.0.40
codegen_flags: <defaults>
</compile_context>

<pallas_src>
import numpy as np
import jax
import jax.numpy as jnp
from jax import lax
from jax.experimental import pallas as pl
from jax.experimental.pallas import tpu as pltpu

VMEM = pltpu.MemorySpace.VMEM

CINP = 8     # conv1 input channels padded 3 -> 8
C1P  = 8     # conv1 output channels padded 6 -> 8
C2P  = 16    # conv2 output channels padded 12 -> 16
NR1  = 13    # conv1 output rows consumed downstream (rows 0..12)
NP1  = 6     # pool1 output rows consumed downstream (rows 0..5)
NCOL = 32    # conv1 stride-1 ("a trous") columns per row (32*B lanes -> 128 at B=4)


# ------------------------------ fused kernel --------------------------------
#
# Lane convention: lane = spatial_column * B + batch (batch minor) everywhere.
# Stride-2 column subsampling is handled by evaluating each stage at stride-1 columns
# (dilated formulation), so every downstream tap is a plain static offset slice.

def _cnnfm_kernel(rhs1_ref, w1_ref, b1_ref, w2_ref, b2_ref,
                  emb_ref, vcat_ref, blin_ref, o_ref):
    f32 = jnp.float32
    B = o_ref.shape[1]
    W = NCOL * B                                   # lanes per conv1 row block

    # ---- conv1: ONE dot over all 13 needed output rows, + bias + ReLU -------
    # rhs1 (built in wrapper): row = (ky*3+kx)*CINP + cin, lane = (r*32 + n)*B + b.
    y1 = jnp.maximum(
        jnp.dot(w1_ref[...], rhs1_ref[...], preferred_element_type=f32)
        + b1_ref[...], 0.0)                        # (C1P, NR1*W) f32

    # ---- maxpool1 3x3 / stride 2 ---------------------------------------------
    # Row-max first (vreg-aligned 32*B blocks), then column-max (dilation-2 offsets).
    # p1[0] = conv2 zero top-pad row; p1[1+py] = [4-col zero left-pad | pool row py],
    # real pool col px lives at lane column 4*(px+1) (dilation 4).
    zrow = jnp.zeros((C1P, W), f32)
    zpad = jnp.zeros((C1P, 4 * B), f32)
    p1 = [zrow]
    for py in range(NP1):
        r0 = 2 * py
        vmax = jnp.maximum(
            jnp.maximum(y1[:, r0 * W:(r0 + 1) * W], y1[:, (r0 + 1) * W:(r0 + 2) * W]),
            y1[:, (r0 + 2) * W:(r0 + 3) * W])                     # (C1P, W)
        hmax = jnp.maximum(
            jnp.maximum(vmax[:, 0:28 * B], vmax[:, 2 * B:30 * B]),
            vmax[:, 4 * B:32 * B])                                # (C1P, 28*B)
        p1.append(jnp.concatenate([zpad, hmax], axis=1))          # (C1P, W)

    # ---- conv2 3x3 / stride 2 / pad 1 + ReLU: ONE dot over the 3 rows pool2 needs
    taps = []
    for ky in range(3):
        for kx in range(3):
            taps.append(jnp.concatenate(
                [p1[2 * j + ky][:, 4 * kx * B:(4 * kx + 17) * B] for j in range(3)],
                axis=1))                                          # (C1P, 3*17*B)
    rhs2 = jnp.concatenate(taps, axis=0).astype(jnp.bfloat16)     # (9*C1P, 3*17*B)
    y2 = jnp.maximum(
        jnp.dot(w2_ref[...], rhs2, preferred_element_type=f32)
        + b2_ref[...], 0.0)                                       # (C2P, 3*17*B)

    # ---- maxpool2 3x3 / stride 2 -> single spatial position (dilation 8) ----
    img = None
    for ky in range(3):
        for kx in range(3):
            off = (ky * 17 + 8 * kx) * B
            t = y2[:, off:off + B]                                # (C2P, B)
            img = t if img is None else jnp.maximum(img, t)

    # ---- FactorizationMachine: ONE fused dot [v ; v*v ; w_lin] @ [feat | feat^2]
    feat = jnp.concatenate([emb_ref[...], img], axis=0)           # (DP, B) f32
    fm = jnp.dot(vcat_ref[...],
                 jnp.concatenate([feat, feat * feat], axis=1),
                 preferred_element_type=f32)                      # (2L+1, 2B)
    L = (vcat_ref.shape[0] - 1) // 2
    xv = fm[0:L, 0:B]                                             # v    @ feat
    x2v2 = fm[L:2 * L, B:2 * B]                                   # v^2  @ feat^2
    lin = fm[2 * L:2 * L + 1, 0:B]                                # wlin @ feat
    pair = jnp.sum(xv * xv - x2v2, axis=0, keepdims=True)         # (1, B)
    o_ref[...] = lin + blin_ref[...] + 0.5 * pair


# ------------------------------ wrapper --------------------------------------

def cnn_fm_forward(params, offsets, user_isbn, img_nchw):
    B = user_isbn.shape[0]
    E2 = 2 * params["emb_table"].shape[1]
    latent = params["fm_v"].shape[1]
    fm_dim = E2 + 12
    DP = E2 + C2P

    # FeaturesEmbedding: offset add + table gather (plain JAX glue; a tiny-table gather
    # has no useful Pallas TPU lowering).
    idx = user_isbn.astype(jnp.int32) + offsets[None, :]
    emb = jnp.take(params["emb_table"], idx.reshape(-1), axis=0).reshape(B, E2)
    emb_t = emb.T.astype(jnp.float32)                             # (2E, B)

    # conv1 im2col RHS built wrapper-side (layout plumbing, DMA'd once): the kernel's
    # conv1 stage becomes a single lane-dense MXU dot with zero unaligned tap slices.
    xpad = jnp.pad(img_nchw.astype(jnp.float32), ((0, 0), (0, 0), (1, 1), (1, 1)))
    planes = []
    for ky in range(3):
        for kx in range(3):
            p = xpad[:, :, ky:ky + 2 * NR1 - 1:2, kx:kx + NCOL]   # (B, 3, NR1, 32)
            p = jnp.transpose(p, (1, 2, 3, 0)).reshape(3, NR1 * NCOL * B)
            planes.append(jnp.pad(p, ((0, CINP - 3), (0, 0))))
    rhs1 = jnp.concatenate(planes, axis=0).astype(jnp.bfloat16)   # (72, NR1*32*B)

    # Conv weights -> (Cout_pad, 9*Cin_pad) matmul layout, bf16 (f32 accumulate).
    w1 = jnp.pad(jnp.transpose(params["conv1_w"], (0, 2, 3, 1)),
                 ((0, C1P - 6), (0, 0), (0, 0), (0, CINP - 3)))
    w1m = w1.reshape(C1P, 9 * CINP).astype(jnp.bfloat16)
    b1 = jnp.pad(params["conv1_b"], (0, C1P - 6)).reshape(C1P, 1).astype(jnp.float32)
    w2 = jnp.pad(jnp.transpose(params["conv2_w"], (0, 2, 3, 1)),
                 ((0, C2P - 12), (0, 0), (0, 0), (0, C1P - 6)))
    w2m = w2.reshape(C2P, 9 * C1P).astype(jnp.bfloat16)
    b2 = jnp.pad(params["conv2_b"], (0, C2P - 12)).reshape(C2P, 1).astype(jnp.float32)

    # FM params fused into one operand [v ; v*v ; w_lin] over DP = 2E + C2P feature
    # rows (padded img channels 12..15 get zero columns -> inert).
    vt = jnp.zeros((latent, DP), jnp.float32).at[:, :fm_dim].set(params["fm_v"].T)
    wl = jnp.zeros((1, DP), jnp.float32).at[:, :fm_dim].set(params["lin_w"])
    vcat = jnp.concatenate([vt, vt * vt, wl], axis=0)             # (2L+1, DP)
    blin = params["lin_b"].reshape(1, 1).astype(jnp.float32)

    out = pl.pallas_call(
        _cnnfm_kernel,
        out_shape=jax.ShapeDtypeStruct((1, B), jnp.float32),
        in_specs=[pl.BlockSpec(memory_space=VMEM)] * 8,
        out_specs=pl.BlockSpec(memory_space=VMEM),
    )(rhs1, w1m, b1, w2m, b2, emb_t, vcat, blin)
    return out[0]


# ------------------------------ parameters -----------------------------------

def init_params(key, n_user, n_isbn, embed_dim, latent_dim):
    ks = jax.random.split(key, 8)
    num_emb = n_user + n_isbn
    fm_dim = 2 * embed_dim + 12
    bound_emb = float(np.sqrt(6.0 / (num_emb + embed_dim)))      # xavier_uniform_
    params = dict(
        emb_table=jax.random.uniform(ks[0], (num_emb, embed_dim), jnp.float32,
                                     -bound_emb, bound_emb),
        conv1_w=jax.random.normal(ks[1], (6, 3, 3, 3), jnp.float32) * 0.1,
        conv1_b=jax.random.normal(ks[2], (6,), jnp.float32) * 0.1,
        conv2_w=jax.random.normal(ks[3], (12, 6, 3, 3), jnp.float32) * 0.1,
        conv2_b=jax.random.normal(ks[4], (12,), jnp.float32) * 0.1,
        fm_v=jax.random.uniform(ks[5], (fm_dim, latent_dim), jnp.float32),  # torch.rand
        lin_w=jax.random.normal(ks[6], (1, fm_dim), jnp.float32) * 0.1,
        lin_b=jax.random.normal(ks[7], (1,), jnp.float32) * 0.1,
    )
    offsets = jnp.array([0, n_user], dtype=jnp.int32)
    return params, offsets


# ------------------------------ reference ------------------------------------

def reference_forward(params, offsets, user_isbn, img_nchw):
    B = user_isbn.shape[0]
    idx = user_isbn.astype(jnp.int32) + offsets[None, :]
    emb = jnp.take(params["emb_table"], idx.reshape(-1), axis=0).reshape(B, -1)

    def conv(x, w, b):
        y = lax.conv_general_dilated(x, w, (2, 2), ((1, 1), (1, 1)),
                                     dimension_numbers=("NCHW", "OIHW", "NCHW"))
        return jax.nn.relu(y + b[None, :, None, None])

    def pool(x):
        return lax.reduce_window(x, -jnp.inf, lax.max,
                                 (1, 1, 3, 3), (1, 1, 2, 2), "VALID")

    x = img_nchw.astype(jnp.float32)
    x = pool(conv(x, params["conv1_w"], params["conv1_b"]))
    x = pool(conv(x, params["conv2_w"], params["conv2_b"]))
    img_feat = x.reshape(B, -1)
    feat = jnp.concatenate([emb, img_feat], axis=1)
    lin = feat @ params["lin_w"].T + params["lin_b"]
    v = params["fm_v"]
    pair = jnp.sum((feat @ v) ** 2 - (feat ** 2) @ (v ** 2), axis=1, keepdims=True)
    return (lin + 0.5 * pair)[:, 0]


# --------------------------------- main ---------------------------------------

if __name__ == "__main__":
    n_user, n_isbn = 7, 11            # len(data['user2idx']), len(data['isbn2idx'])
    cnn_embed_dim, cnn_latent_dim = 16, 8
    B = 4                             # 32 stride-1 cols * B = 128 lanes (vreg aligned)

    root = jax.random.PRNGKey(0)
    k_params, k_u, k_i, k_img = jax.random.split(root, 4)
    params, offsets = init_params(k_params, n_user, n_isbn,
                                  cnn_embed_dim, cnn_latent_dim)

    user_isbn = jnp.stack(
        [jax.random.randint(k_u, (B,), 0, n_user),
         jax.random.randint(k_i, (B,), 0, n_isbn)], axis=1).astype(jnp.int32)
    img = jax.random.normal(k_img, (B, 3, 32, 32), jnp.float32)

    fwd = jax.jit(cnn_fm_forward)
    out = jax.block_until_ready(fwd(params, offsets, user_isbn, img))
    ref = jax.block_until_ready(reference_forward(params, offsets, user_isbn, img))

    assert out.shape == (B,)
    np.testing.assert_allclose(np.asarray(out), np.asarray(ref), rtol=2e-2, atol=1e-1)
    print("KERNEL_OK")
</pallas_src>

<mosaic_0001>
module attributes {stable_mosaic.version = 11 : i64} {
  func.func @_cnnfm_kernel(%arg0: memref<72x1664xbf16, #tpu.memory_space<vmem>>, %arg1: memref<8x72xbf16, #tpu.memory_space<vmem>>, %arg2: memref<8x1xf32, #tpu.memory_space<vmem>>, %arg3: memref<16x72xbf16, #tpu.memory_space<vmem>>, %arg4: memref<16x1xf32, #tpu.memory_space<vmem>>, %arg5: memref<32x4xf32, #tpu.memory_space<vmem>>, %arg6: memref<17x48xf32, #tpu.memory_space<vmem>>, %arg7: memref<1x1xf32, #tpu.memory_space<vmem>>, %arg8: memref<1x4xf32, #tpu.memory_space<vmem>>) attributes {dimension_semantics = [], scalar_prefetch = 0 : i64, scratch_operands = 0 : i64, tpu.core_type = #tpu.core_type<tc>} {
    %c0 = arith.constant 0 : index
    %c0_0 = arith.constant 0 : index
    %0 = vector.load %arg1[%c0, %c0_0] : memref<8x72xbf16, #tpu.memory_space<vmem>>, vector<8x72xbf16>
    %c0_1 = arith.constant 0 : index
    %c0_2 = arith.constant 0 : index
    %1 = vector.load %arg0[%c0_1, %c0_2] : memref<72x1664xbf16, #tpu.memory_space<vmem>>, vector<72x1664xbf16>
    %cst = arith.constant dense<0.000000e+00> : vector<8x1664xf32>
    %2 = tpu.matmul %0, %1, %cst {dimension_numbers = #tpu.dot_dimension_numbers<[1], [0], [0], [1], [0, 0, 1, 1], [], []>} : vector<8x72xbf16>, vector<72x1664xbf16>, vector<8x1664xf32> -> vector<8x1664xf32>
    %c0_3 = arith.constant 0 : index
    %c0_4 = arith.constant 0 : index
    %3 = vector.load %arg2[%c0_3, %c0_4] : memref<8x1xf32, #tpu.memory_space<vmem>>, vector<8x1xf32>
    %4 = vector.broadcast %3 : vector<8x1xf32> to vector<8x1664xf32>
    %5 = arith.addf %2, %4 : vector<8x1664xf32>
    %cst_5 = arith.constant 0.000000e+00 : f32
    %6 = vector.broadcast %cst_5 : f32 to vector<8x1664xf32>
    %7 = arith.maximumf %5, %6 : vector<8x1664xf32>
    %cst_6 = arith.constant 0.000000e+00 : f32
    %8 = vector.broadcast %cst_6 : f32 to vector<8x128xf32>
    %cst_7 = arith.constant 0.000000e+00 : f32
    %9 = vector.broadcast %cst_7 : f32 to vector<8x16xf32>
    %10 = vector.extract_strided_slice %7 {offsets = [0, 0], sizes = [8, 128], strides = [1, 1]} : vector<8x1664xf32> to vector<8x128xf32>
    %11 = vector.extract_strided_slice %7 {offsets = [0, 128], sizes = [8, 128], strides = [1, 1]} : vector<8x1664xf32> to vector<8x128xf32>
    %12 = arith.maximumf %10, %11 : vector<8x128xf32>
    %13 = vector.extract_strided_slice %7 {offsets = [0, 256], sizes = [8, 128], strides = [1, 1]} : vector<8x1664xf32> to vector<8x128xf32>
    %14 = arith.maximumf %12, %13 : vector<8x128xf32>
    %15 = vector.extract_strided_slice %14 {offsets = [0, 0], sizes = [8, 112], strides = [1, 1]} : vector<8x128xf32> to vector<8x112xf32>
    %16 = vector.extract_strided_slice %14 {offsets = [0, 8], sizes = [8, 112], strides = [1, 1]} : vector<8x128xf32> to vector<8x112xf32>
    %17 = arith.maximumf %15, %16 : vector<8x112xf32>
    %18 = vector.extract_strided_slice %14 {offsets = [0, 16], sizes = [8, 112], strides = [1, 1]} : vector<8x128xf32> to vector<8x112xf32>
    %19 = arith.maximumf %17, %18 : vector<8x112xf32>
    %20 = tpu.concatenate %9, %19 in 1 : vector<8x16xf32>, vector<8x112xf32> -> vector<8x128xf32>
    %21 = vector.extract_strided_slice %7 {offsets = [0, 256], sizes = [8, 128], strides = [1, 1]} : vector<8x1664xf32> to vector<8x128xf32>
    %22 = vector.extract_strided_slice %7 {offsets = [0, 384], sizes = [8, 128], strides = [1, 1]} : vector<8x1664xf32> to vector<8x128xf32>
    %23 = arith.maximumf %21, %22 : vector<8x128xf32>
    %24 = vector.extract_strided_slice %7 {offsets = [0, 512], sizes = [8, 128], strides = [1, 1]} : vector<8x1664xf32> to vector<8x128xf32>
    %25 = arith.maximumf %23, %24 : vector<8x128xf32>
    %26 = vector.extract_strided_slice %25 {offsets = [0, 0], sizes = [8, 112], strides = [1, 1]} : vector<8x128xf32> to vector<8x112xf32>
    %27 = vector.extract_strided_slice %25 {offsets = [0, 8], sizes = [8, 112], strides = [1, 1]} : vector<8x128xf32> to vector<8x112xf32>
    %28 = arith.maximumf %26, %27 : vector<8x112xf32>
    %29 = vector.extract_strided_slice %25 {offsets = [0, 16], sizes = [8, 112], strides = [1, 1]} : vector<8x128xf32> to vector<8x112xf32>
    %30 = arith.maximumf %28, %29 : vector<8x112xf32>
    %31 = tpu.concatenate %9, %30 in 1 : vector<8x16xf32>, vector<8x112xf32> -> vector<8x128xf32>
    %32 = vector.extract_strided_slice %7 {offsets = [0, 512], sizes = [8, 128], strides = [1, 1]} : vector<8x1664xf32> to vector<8x128xf32>
    %33 = vector.extract_strided_slice %7 {offsets = [0, 640], sizes = [8, 128], strides = [1, 1]} : vector<8x1664xf32> to vector<8x128xf32>
    %34 = arith.maximumf %32, %33 : vector<8x128xf32>
    %35 = vector.extract_strided_slice %7 {offsets = [0, 768], sizes = [8, 128], strides = [1, 1]} : vector<8x1664xf32> to vector<8x128xf32>
    %36 = arith.maximumf %34, %35 : vector<8x128xf32>
    %37 = vector.extract_strided_slice %36 {offsets = [0, 0], sizes = [8, 112], strides = [1, 1]} : vector<8x128xf32> to vector<8x112xf32>
    %38 = vector.extract_strided_slice %36 {offsets = [0, 8], sizes = [8, 112], strides = [1, 1]} : vector<8x128xf32> to vector<8x112xf32>
    %39 = arith.maximumf %37, %38 : vector<8x112xf32>
    %40 = vector.extract_strided_slice %36 {offsets = [0, 16], sizes = [8, 112], strides = [1, 1]} : vector<8x128xf32> to vector<8x112xf32>
    %41 = arith.maximumf %39, %40 : vector<8x112xf32>
    %42 = tpu.concatenate %9, %41 in 1 : vector<8x16xf32>, vector<8x112xf32> -> vector<8x128xf32>
    %43 = vector.extract_strided_slice %7 {offsets = [0, 768], sizes = [8, 128], strides = [1, 1]} : vector<8x1664xf32> to vector<8x128xf32>
    %44 = vector.extract_strided_slice %7 {offsets = [0, 896], sizes = [8, 128], strides = [1, 1]} : vector<8x1664xf32> to vector<8x128xf32>
    %45 = arith.maximumf %43, %44 : vector<8x128xf32>
    %46 = vector.extract_strided_slice %7 {offsets = [0, 1024], sizes = [8, 128], strides = [1, 1]} : vector<8x1664xf32> to vector<8x128xf32>
    %47 = arith.maximumf %45, %46 : vector<8x128xf32>
    %48 = vector.extract_strided_slice %47 {offsets = [0, 0], sizes = [8, 112], strides = [1, 1]} : vector<8x128xf32> to vector<8x112xf32>
    %49 = vector.extract_strided_slice %47 {offsets = [0, 8], sizes = [8, 112], strides = [1, 1]} : vector<8x128xf32> to vector<8x112xf32>
    %50 = arith.maximumf %48, %49 : vector<8x112xf32>
    %51 = vector.extract_strided_slice %47 {offsets = [0, 16], sizes = [8, 112], strides = [1, 1]} : vector<8x128xf32> to vector<8x112xf32>
    %52 = arith.maximumf %50, %51 : vector<8x112xf32>
    %53 = tpu.concatenate %9, %52 in 1 : vector<8x16xf32>, vector<8x112xf32> -> vector<8x128xf32>
    %54 = vector.extract_strided_slice %7 {offsets = [0, 1024], sizes = [8, 128], strides = [1, 1]} : vector<8x1664xf32> to vector<8x128xf32>
    %55 = vector.extract_strided_slice %7 {offsets = [0, 1152], sizes = [8, 128], strides = [1, 1]} : vector<8x1664xf32> to vector<8x128xf32>
    %56 = arith.maximumf %54, %55 : vector<8x128xf32>
    %57 = vector.extract_strided_slice %7 {offsets = [0, 1280], sizes = [8, 128], strides = [1, 1]} : vector<8x1664xf32> to vector<8x128xf32>
    %58 = arith.maximumf %56, %57 : vector<8x128xf32>
    %59 = vector.extract_strided_slice %58 {offsets = [0, 0], sizes = [8, 112], strides = [1, 1]} : vector<8x128xf32> to vector<8x112xf32>
    %60 = vector.extract_strided_slice %58 {offsets = [0, 8], sizes = [8, 112], strides = [1, 1]} : vector<8x128xf32> to vector<8x112xf32>
    %61 = arith.maximumf %59, %60 : vector<8x112xf32>
    %62 = vector.extract_strided_slice %58 {offsets = [0, 16], sizes = [8, 112], strides = [1, 1]} : vector<8x128xf32> to vector<8x112xf32>
    %63 = arith.maximumf %61, %62 : vector<8x112xf32>
    %64 = tpu.concatenate %9, %63 in 1 : vector<8x16xf32>, vector<8x112xf32> -> vector<8x128xf32>
    %65 = vector.extract_strided_slice %7 {offsets = [0, 1280], sizes = [8, 128], strides = [1, 1]} : vector<8x1664xf32> to vector<8x128xf32>
    %66 = vector.extract_strided_slice %7 {offsets = [0, 1408], sizes = [8, 128], strides = [1, 1]} : vector<8x1664xf32> to vector<8x128xf32>
    %67 = arith.maximumf %65, %66 : vector<8x128xf32>
    %68 = vector.extract_strided_slice %7 {offsets = [0, 1536], sizes = [8, 128], strides = [1, 1]} : vector<8x1664xf32> to vector<8x128xf32>
    %69 = arith.maximumf %67, %68 : vector<8x128xf32>
    %70 = vector.extract_strided_slice %69 {offsets = [0, 0], sizes = [8, 112], strides = [1, 1]} : vector<8x128xf32> to vector<8x112xf32>
    %71 = vector.extract_strided_slice %69 {offsets = [0, 8], sizes = [8, 112], strides = [1, 1]} : vector<8x128xf32> to vector<8x112xf32>
    %72 = arith.maximumf %70, %71 : vector<8x112xf32>
    %73 = vector.extract_strided_slice %69 {offsets = [0, 16], sizes = [8, 112], strides = [1, 1]} : vector<8x128xf32> to vector<8x112xf32>
    %74 = arith.maximumf %72, %73 : vector<8x112xf32>
    %75 = tpu.concatenate %9, %74 in 1 : vector<8x16xf32>, vector<8x112xf32> -> vector<8x128xf32>
    %76 = vector.extract_strided_slice %8 {offsets = [0, 0], sizes = [8, 68], strides = [1, 1]} : vector<8x128xf32> to vector<8x68xf32>
    %77 = vector.extract_strided_slice %31 {offsets = [0, 0], sizes = [8, 68], strides = [1, 1]} : vector<8x128xf32> to vector<8x68xf32>
    %78 = vector.extract_strided_slice %53 {offsets = [0, 0], sizes = [8, 68], strides = [1, 1]} : vector<8x128xf32> to vector<8x68xf32>
    %79 = tpu.concatenate %76, %77, %78 in 1 : vector<8x68xf32>, vector<8x68xf32>, vector<8x68xf32> -> vector<8x204xf32>
    %80 = vector.extract_strided_slice %8 {offsets = [0, 16], sizes = [8, 68], strides = [1, 1]} : vector<8x128xf32> to vector<8x68xf32>
    %81 = vector.extract_strided_slice %31 {offsets = [0, 16], sizes = [8, 68], strides = [1, 1]} : vector<8x128xf32> to vector<8x68xf32>
    %82 = vector.extract_strided_slice %53 {offsets = [0, 16], sizes = [8, 68], strides = [1, 1]} : vector<8x128xf32> to vector<8x68xf32>
    %83 = tpu.concatenate %80, %81, %82 in 1 : vector<8x68xf32>, vector<8x68xf32>, vector<8x68xf32> -> vector<8x204xf32>
    %84 = vector.extract_strided_slice %8 {offsets = [0, 32], sizes = [8, 68], strides = [1, 1]} : vector<8x128xf32> to vector<8x68xf32>
    %85 = vector.extract_strided_slice %31 {offsets = [0, 32], sizes = [8, 68], strides = [1, 1]} : vector<8x128xf32> to vector<8x68xf32>
    %86 = vector.extract_strided_slice %53 {offsets = [0, 32], sizes = [8, 68], strides = [1, 1]} : vector<8x128xf32> to vector<8x68xf32>
    %87 = tpu.concatenate %84, %85, %86 in 1 : vector<8x68xf32>, vector<8x68xf32>, vector<8x68xf32> -> vector<8x204xf32>
    %88 = vector.extract_strided_slice %20 {offsets = [0, 0], sizes = [8, 68], strides = [1, 1]} : vector<8x128xf32> to vector<8x68xf32>
    %89 = vector.extract_strided_slice %42 {offsets = [0, 0], sizes = [8, 68], strides = [1, 1]} : vector<8x128xf32> to vector<8x68xf32>
    %90 = vector.extract_strided_slice %64 {offsets = [0, 0], sizes = [8, 68], strides = [1, 1]} : vector<8x128xf32> to vector<8x68xf32>
    %91 = tpu.concatenate %88, %89, %90 in 1 : vector<8x68xf32>, vector<8x68xf32>, vector<8x68xf32> -> vector<8x204xf32>
    %92 = vector.extract_strided_slice %20 {offsets = [0, 16], sizes = [8, 68], strides = [1, 1]} : vector<8x128xf32> to vector<8x68xf32>
    %93 = vector.extract_strided_slice %42 {offsets = [0, 16], sizes = [8, 68], strides = [1, 1]} : vector<8x128xf32> to vector<8x68xf32>
    %94 = vector.extract_strided_slice %64 {offsets = [0, 16], sizes = [8, 68], strides = [1, 1]} : vector<8x128xf32> to vector<8x68xf32>
    %95 = tpu.concatenate %92, %93, %94 in 1 : vector<8x68xf32>, vector<8x68xf32>, vector<8x68xf32> -> vector<8x204xf32>
    %96 = vector.extract_strided_slice %20 {offsets = [0, 32], sizes = [8, 68], strides = [1, 1]} : vector<8x128xf32> to vector<8x68xf32>
    %97 = vector.extract_strided_slice %42 {offsets = [0, 32], sizes = [8, 68], strides = [1, 1]} : vector<8x128xf32> to vector<8x68xf32>
    %98 = vector.extract_strided_slice %64 {offsets = [0, 32], sizes = [8, 68], strides = [1, 1]} : vector<8x128xf32> to vector<8x68xf32>
    %99 = tpu.concatenate %96, %97, %98 in 1 : vector<8x68xf32>, vector<8x68xf32>, vector<8x68xf32> -> vector<8x204xf32>
    %100 = vector.extract_strided_slice %31 {offsets = [0, 0], sizes = [8, 68], strides = [1, 1]} : vector<8x128xf32> to vector<8x68xf32>
    %101 = vector.extract_strided_slice %53 {offsets = [0, 0], sizes = [8, 68], strides = [1, 1]} : vector<8x128xf32> to vector<8x68xf32>
    %102 = vector.extract_strided_slice %75 {offsets = [0, 0], sizes = [8, 68], strides = [1, 1]} : vector<8x128xf32> to vector<8x68xf32>
    %103 = tpu.concatenate %100, %101, %102 in 1 : vector<8x68xf32>, vector<8x68xf32>, vector<8x68xf32> -> vector<8x204xf32>
    %104 = vector.extract_strided_slice %31 {offsets = [0, 16], sizes = [8, 68], strides = [1, 1]} : vector<8x128xf32> to vector<8x68xf32>
    %105 = vector.extract_strided_slice %53 {offsets = [0, 16], sizes = [8, 68], strides = [1, 1]} : vector<8x128xf32> to vector<8x68xf32>
    %106 = vector.extract_strided_slice %75 {offsets = [0, 16], sizes = [8, 68], strides = [1, 1]} : vector<8x128xf32> to vector<8x68xf32>
    %107 = tpu.concatenate %104, %105, %106 in 1 : vector<8x68xf32>, vector<8x68xf32>, vector<8x68xf32> -> vector<8x204xf32>
    %108 = vector.extract_strided_slice %31 {offsets = [0, 32], sizes = [8, 68], strides = [1, 1]} : vector<8x128xf32> to vector<8x68xf32>
    %109 = vector.extract_strided_slice %53 {offsets = [0, 32], sizes = [8, 68], strides = [1, 1]} : vector<8x128xf32> to vector<8x68xf32>
    %110 = vector.extract_strided_slice %75 {offsets = [0, 32], sizes = [8, 68], strides = [1, 1]} : vector<8x128xf32> to vector<8x68xf32>
    %111 = tpu.concatenate %108, %109, %110 in 1 : vector<8x68xf32>, vector<8x68xf32>, vector<8x68xf32> -> vector<8x204xf32>
    %112 = tpu.concatenate %79, %83, %87, %91, %95, %99, %103, %107, %111 in 0 : vector<8x204xf32>, vector<8x204xf32>, vector<8x204xf32>, vector<8x204xf32>, vector<8x204xf32>, vector<8x204xf32>, vector<8x204xf32>, vector<8x204xf32>, vector<8x204xf32> -> vector<72x204xf32>
    %113 = arith.truncf %112 : vector<72x204xf32> to vector<72x204xbf16>
    %c0_8 = arith.constant 0 : index
    %c0_9 = arith.constant 0 : index
    %114 = vector.load %arg3[%c0_8, %c0_9] : memref<16x72xbf16, #tpu.memory_space<vmem>>, vector<16x72xbf16>
    %cst_10 = arith.constant dense<0.000000e+00> : vector<16x204xf32>
    %115 = tpu.matmul %114, %113, %cst_10 {dimension_numbers = #tpu.dot_dimension_numbers<[1], [0], [0], [1], [0, 0, 1, 1], [], []>} : vector<16x72xbf16>, vector<72x204xbf16>, vector<16x204xf32> -> vector<16x204xf32>
    %c0_11 = arith.constant 0 : index
    %c0_12 = arith.constant 0 : index
    %116 = vector.load %arg4[%c0_11, %c0_12] : memref<16x1xf32, #tpu.memory_space<vmem>>, vector<16x1xf32>
    %117 = vector.broadcast %116 : vector<16x1xf32> to vector<16x204xf32>
    %118 = arith.addf %115, %117 : vector<16x204xf32>
    %cst_13 = arith.constant 0.000000e+00 : f32
    %119 = vector.broadcast %cst_13 : f32 to vector<16x204xf32>
    %120 = arith.maximumf %118, %119 : vector<16x204xf32>
    %121 = vector.extract_strided_slice %120 {offsets = [0, 0], sizes = [16, 4], strides = [1, 1]} : vector<16x204xf32> to vector<16x4xf32>
    %122 = vector.extract_strided_slice %120 {offsets = [0, 32], sizes = [16, 4], strides = [1, 1]} : vector<16x204xf32> to vector<16x4xf32>
    %123 = arith.maximumf %121, %122 : vector<16x4xf32>
    %124 = vector.extract_strided_slice %120 {offsets = [0, 64], sizes = [16, 4], strides = [1, 1]} : vector<16x204xf32> to vector<16x4xf32>
    %125 = arith.maximumf %123, %124 : vector<16x4xf32>
    %126 = vector.extract_strided_slice %120 {offsets = [0, 68], sizes = [16, 4], strides = [1, 1]} : vector<16x204xf32> to vector<16x4xf32>
    %127 = arith.maximumf %125, %126 : vector<16x4xf32>
    %128 = vector.extract_strided_slice %120 {offsets = [0, 100], sizes = [16, 4], strides = [1, 1]} : vector<16x204xf32> to vector<16x4xf32>
    %129 = arith.maximumf %127, %128 : vector<16x4xf32>
    %130 = vector.extract_strided_slice %120 {offsets = [0, 132], sizes = [16, 4], strides = [1, 1]} : vector<16x204xf32> to vector<16x4xf32>
    %131 = arith.maximumf %129, %130 : vector<16x4xf32>
    %132 = vector.extract_strided_slice %120 {offsets = [0, 136], sizes = [16, 4], strides = [1, 1]} : vector<16x204xf32> to vector<16x4xf32>
    %133 = arith.maximumf %131, %132 : vector<16x4xf32>
    %134 = vector.extract_strided_slice %120 {offsets = [0, 168], sizes = [16, 4], strides = [1, 1]} : vector<16x204xf32> to vector<16x4xf32>
    %135 = arith.maximumf %133, %134 : vector<16x4xf32>
    %136 = vector.extract_strided_slice %120 {offsets = [0, 200], sizes = [16, 4], strides = [1, 1]} : vector<16x204xf32> to vector<16x4xf32>
    %137 = arith.maximumf %135, %136 : vector<16x4xf32>
    %c0_14 = arith.constant 0 : index
    %c0_15 = arith.constant 0 : index
    %138 = vector.load %arg5[%c0_14, %c0_15] : memref<32x4xf32, #tpu.memory_space<vmem>>, vector<32x4xf32>
    %139 = tpu.concatenate %138, %137 in 0 : vector<32x4xf32>, vector<16x4xf32> -> vector<48x4xf32>
    %c0_16 = arith.constant 0 : index
    %c0_17 = arith.constant 0 : index
    %140 = vector.load %arg6[%c0_16, %c0_17] : memref<17x48xf32, #tpu.memory_space<vmem>>, vector<17x48xf32>
    %141 = arith.mulf %139, %139 : vector<48x4xf32>
    %142 = tpu.concatenate %139, %141 in 1 : vector<48x4xf32>, vector<48x4xf32> -> vector<48x8xf32>
    %cst_18 = arith.constant dense<0.000000e+00> : vector<17x8xf32>
    %143 = tpu.matmul %140, %142, %cst_18 {dimension_numbers = #tpu.dot_dimension_numbers<[1], [0], [0], [1], [0, 0, 1, 1], [], []>} : vector<17x48xf32>, vector<48x8xf32>, vector<17x8xf32> -> vector<17x8xf32>
    %144 = vector.extract_strided_slice %143 {offsets = [0, 0], sizes = [8, 4], strides = [1, 1]} : vector<17x8xf32> to vector<8x4xf32>
    %145 = vector.extract_strided_slice %143 {offsets = [8, 4], sizes = [8, 4], strides = [1, 1]} : vector<17x8xf32> to vector<8x4xf32>
    %146 = vector.extract_strided_slice %143 {offsets = [16, 0], sizes = [1, 4], strides = [1, 1]} : vector<17x8xf32> to vector<1x4xf32>
    %147 = arith.mulf %144, %144 : vector<8x4xf32>
    %148 = arith.subf %147, %145 : vector<8x4xf32>
    %cst_19 = arith.constant dense<0.000000e+00> : vector<4xf32>
    %149 = vector.multi_reduction <add>, %148, %cst_19 [0] : vector<8x4xf32> to vector<4xf32>
    %150 = vector.shape_cast %149 : vector<4xf32> to vector<1x4xf32>
    %c0_20 = arith.constant 0 : index
    %c0_21 = arith.constant 0 : index
    %151 = vector.load %arg7[%c0_20, %c0_21] : memref<1x1xf32, #tpu.memory_space<vmem>>, vector<1x1xf32>
    %152 = vector.broadcast %151 : vector<1x1xf32> to vector<1x4xf32>
    %153 = arith.addf %146, %152 : vector<1x4xf32>
    %cst_22 = arith.constant 5.000000e-01 : f32
    %154 = vector.broadcast %cst_22 : f32 to vector<1x4xf32>
    %155 = arith.mulf %154, %150 : vector<1x4xf32>
    %156 = arith.addf %153, %155 : vector<1x4xf32>
    %c0_23 = arith.constant 0 : index
    %c0_24 = arith.constant 0 : index
    %157 = vector.load %arg8[%c0_23, %c0_24] : memref<1x4xf32, #tpu.memory_space<vmem>>, vector<1x4xf32>
    tpu.vector_store %arg8[%c0_23, %c0_24], %156 {strides = array<i32>} : memref<1x4xf32, #tpu.memory_space<vmem>>, vector<1x4xf32>,
    return
  }
}

</mosaic_0001>

<bundles_post_ra>
// kernel: cnn_fm_forward.1
= control target key start
LH: loop header
LB: loop body
LE: loop exit
PB: predicated region body
PF: predicated region fallthrough
CT: control target
= control target key end

     0   :  { %s2069_s0 = inlined_call_operand.vmem [shape: bf16[72,1664], index: 0, kind: input, shape index: {}]   ;;  %s2070_s1 = inlined_call_operand.vmem [shape: bf16[8,72], index: 1, kind: input, shape index: {}]   ;;  %s2071_s2 = inlined_call_operand.vmem [shape: f32[8,1], index: 2, kind: input, shape index: {}]   ;;  %s2072_s3 = inlined_call_operand.vmem [shape: bf16[16,72], index: 3, kind: input, shape index: {}]   ;;  %s2073_s4 = inlined_call_operand.vmem [shape: f32[16,1], index: 4, kind: input, shape index: {}]   ;;  %s2074_s5 = inlined_call_operand.vmem [shape: f32[32,4], index: 5, kind: input, shape index: {}]   ;;  %s2075_s6 = inlined_call_operand.vmem [shape: f32[17,48], index: 6, kind: input, shape index: {}]   ;;  %s2076_s7 = inlined_call_operand.<no memory space> [shape: f32[1,1], index: 7, kind: input, shape index: {}]   ;;  %s2077_s8 = inlined_call_operand.hbm [shape: f32[1,4], index: 8, kind: output, shape index: {}]  }
   0x1   :  { %v13_v0 = vstv %s2076_s7 }
   0x2   :  { %14 = vst [vmem:[#allocation2] sm:$0x1] %v13_v0 }
   0x3   :  { %v90_v1 = vld [vmem:[%s2069_s0 + $0x1a0] sm:$0xff]  ;;  %v91_v2 = vld [vmem:[%s2069_s0 + $0x1a8] sm:$0xff]  ;;  %vm404_vm0 = vcmask 1043456   ;;  %v1232_v7 = vld [vmem:[%s2069_s0 + $0x138] sm:$0xf]  ;;  %v1513_v51 = vmov 0  }
   0x4   :  { %v270_v3 = vunpack.c.l.b16 %v90_v1  ;;  %v271_v4 = vunpack.c.h.b16 %v90_v1  ;;  %v272_v5 = vunpack.c.l.b16 %v91_v2  ;;  %v273_v6 = vunpack.c.h.b16 %v91_v2  ;;  %v1358_v8 = vld [vmem:[%s2069_s0 + $0x168] sm:$0xf0]  ;;  %v1352_v13 = vld [vmem:[%s2069_s0 + $0x13c] sm:$0xf]  ;;  %v1234_v14 = vld [vmem:[%s2069_s0 + $0x16c] sm:$0xf0]  ;;  %1385 = vset.pattern.permute.xlu0 %v1513_v51  ;;  %1471 = vset.pattern.permute.xlu1 %v1513_v51 }
   0x5   :  { %v1240_v15 = vld [vmem:[%s2069_s0 + $0x140] sm:$0xf]  ;;  %v1359_v16 = vld [vmem:[%s2069_s0 + $0x170] sm:$0xf0]  ;;  %v1353_v17 = vld [vmem:[%s2069_s0 + $0x144] sm:$0xf]  ;;  %v1233_v23 = vor.u32 %v1358_v8, %v1232_v7  ;;  %v1237_v24 = vor.u32 %v1352_v13, %v1234_v14 }
   0x6   :  { %v335_v9 = vpack.c.b16 %v270_v3, %v270_v3  ;;  %v336_v10 = vpack.c.b16 %v271_v4, %v271_v4  ;;  %v337_v11 = vpack.c.b16 %v272_v5, %v272_v5  ;;  %v338_v12 = vpack.c.b16 %v273_v6, %v273_v6  ;;  %v1242_v18 = vld [vmem:[%s2069_s0 + $0x174] sm:$0xf0]  ;;  %v1180_v25 = vld [vmem:[%s2069_s0 + $0xd0] sm:$0xf]  ;;  %v1345_v26 = vld [vmem:[%s2069_s0 + $0x100] sm:$0xf0] }
   0x7   :  { %v1241_v27 = vor.u32 %v1359_v16, %v1240_v15  ;;  %v1245_v28 = vor.u32 %v1353_v17, %v1242_v18  ;;  %v1339_v29 = vld [vmem:[%s2069_s0 + $0xd4] sm:$0xf]  ;;  %v1182_v30 = vld [vmem:[%s2069_s0 + $0x104] sm:$0xf0]  ;;  %v1188_v31 = vld [vmem:[%s2069_s0 + $0xd8] sm:$0xf]  ;;  %v1181_v36 = vor.u32 %v1345_v26, %v1180_v25 }
   0x8   :  { %v406_v19 = vsel %vm404_vm0, %v335_v9, 0  ;;  %v409_v20 = vsel %vm404_vm0, %v336_v10, 0  ;;  %v412_v21 = vsel %vm404_vm0, %v337_v11, 0  ;;  %v415_v22 = vsel %vm404_vm0, %v338_v12, 0  ;;  %v1346_v32 = vld [vmem:[%s2069_s0 + $0x108] sm:$0xf0] }
   0x9   :  { %447 = vmatpush.bf16.msra.mxu0 %v406_v19  ;;  %460 = vmatpush.bf16.msra.mxu1 %v409_v20  ;;  %v1340_v33 = vld [vmem:[%s2069_s0 + $0xdc] sm:$0xf]  ;;  %v1190_v34 = vld [vmem:[%s2069_s0 + $0x10c] sm:$0xf0]  ;;  %v1128_v35 = vld [vmem:[%s2069_s0 + $0x68] sm:$0xf]  ;;  %v1185_v37 = vor.u32 %v1339_v29, %v1182_v30  ;;  %v1189_v41 = vor.u32 %v1346_v32, %v1188_v31 }
   0xa   :  { %473 = vmatpush.bf16.msra.mxu2 %v412_v21  ;;  %486 = vmatpush.bf16.msra.mxu3 %v415_v22  ;;  %v1332_v38 = vld [vmem:[%s2069_s0 + $0x98] sm:$0xf0]  ;;  %v1326_v39 = vld [vmem:[%s2069_s0 + $0x6c] sm:$0xf]  ;;  %v1130_v40 = vld [vmem:[%s2069_s0 + $0x9c] sm:$0xf0]  ;;  %v1193_v42 = vor.u32 %v1340_v33, %v1190_v34 }
   0xb   :  { %v1136_v43 = vld [vmem:[%s2069_s0 + $0x70] sm:$0xf]  ;;  %v1333_v44 = vld [vmem:[%s2069_s0 + $0xa0] sm:$0xf0]  ;;  %v1327_v45 = vld [vmem:[%s2069_s0 + $0x74] sm:$0xf]  ;;  %v1129_v52 = vor.u32 %v1332_v38, %v1128_v35  ;;  %v1133_v53 = vor.u32 %v1326_v39, %v1130_v40 }
   0xc   :  { %v1138_v46 = vld [vmem:[%s2069_s0 + $0xa4] sm:$0xf0]  ;;  %v92_v47 = vld [vmem:[%s2069_s0 + $0x1b0] sm:$0xff]  ;;  %v93_v48 = vld [vmem:[%s2069_s0 + $0x1b8] sm:$0xff]  ;;  %v1137_v58 = vor.u32 %v1333_v44, %v1136_v43  ;;  %vm400_vm1 = vcmask 588800  }
   0xd   :  { %448 = vmatpush.bf16.msra.mxu0 %v1233_v23  ;;  %461 = vmatpush.bf16.msra.mxu1 %v1237_v24  ;;  %v274_v49 = vunpack.c.l.b16 %v92_v47  ;;  %v275_v50 = vunpack.c.h.b16 %v92_v47  ;;  %v1076_v54 = vld [vmem:[%s2069_s0] sm:$0xf]  ;;  %v1319_v55 = vld [vmem:[%s2069_s0 + $0x30] sm:$0xf0]  ;;  %v276_v56 = vunpack.c.l.b16 %v93_v48  ;;  %v277_v57 = vunpack.c.h.b16 %v93_v48  ;;  %v1313_v60 = vld [vmem:[%s2069_s0 + $0x4] sm:$0xf] }
   0xe   :  { %474 = vmatpush.bf16.msra.mxu2 %v1241_v27  ;;  %487 = vmatpush.bf16.msra.mxu3 %v1245_v28  ;;  %v1141_v59 = vor.u32 %v1327_v45, %v1138_v46  ;;  %v1078_v61 = vld [vmem:[%s2069_s0 + $0x34] sm:$0xf0]  ;;  %v1084_v62 = vld [vmem:[%s2069_s0 + $0x8] sm:$0xf]  ;;  %v1320_v63 = vld [vmem:[%s2069_s0 + $0x38] sm:$0xf0]  ;;  %v1077_v2 = vor.u32 %v1319_v55, %v1076_v54 }
   0xf   :  { %v1314_v0 = vld [vmem:[%s2069_s0 + $0xc] sm:$0xf]  ;;  %v1086_v1 = vld [vmem:[%s2069_s0 + $0x3c] sm:$0xf0]  ;;  %v339_v3 = vpack.c.b16 %v274_v49, %v274_v49  ;;  %v340_v4 = vpack.c.b16 %v275_v50, %v275_v50  ;;  %v1081_v6 = vor.u32 %v1313_v60, %v1078_v61  ;;  %v341_v7 = vpack.c.b16 %v276_v56, %v276_v56  ;;  %v1248_v11 = vld [vmem:[%s2069_s0 + $0x148] sm:$0xf] }
  0x10   :  { %v97_v5 = vld [vmem:[%s2071_s2] sm:$0xff]  ;;  %v342_v8 = vpack.c.b16 %v277_v57, %v277_v57  ;;  %v1085_v9 = vor.u32 %v1320_v63, %v1084_v62  ;;  %v1089_v10 = vor.u32 %v1314_v0, %v1086_v1  ;;  %v1360_v12 = vld [vmem:[%s2069_s0 + $0x178] sm:$0xf0]  ;;  %v1354_v13 = vld [vmem:[%s2069_s0 + $0x14c] sm:$0xf] }
  0x11   :  { %449 = vmatpush.bf16.msra.mxu0 %v1181_v36  ;;  %462 = vmatpush.bf16.msra.mxu1 %v1185_v37  ;;  %v1250_v14 = vld [vmem:[%s2069_s0 + $0x17c] sm:$0xf0]  ;;  %v418_v15 = vsel %vm404_vm0, %v339_v3, 0  ;;  %v421_v16 = vsel %vm404_vm0, %v340_v4, 0  ;;  %v1256_v17 = vld [vmem:[%s2069_s0 + $0x150] sm:$0xf]  ;;  %v1249_v24 = vor.u32 %v1360_v12, %v1248_v11 }
  0x12   :  { %475 = vmatpush.bf16.msra.mxu2 %v1189_v41  ;;  %488 = vmatpush.bf16.msra.mxu3 %v1193_v42  ;;  %v1361_v18 = vld [vmem:[%s2069_s0 + $0x180] sm:$0xf0]  ;;  %v424_v19 = vsel %vm404_vm0, %v341_v7, 0  ;;  %v427_v20 = vsel %vm404_vm0, %v342_v8, 0  ;;  %v1355_v21 = vld [vmem:[%s2069_s0 + $0x154] sm:$0xf]  ;;  %v1253_v25 = vor.u32 %v1354_v13, %v1250_v14 }
  0x13   :  { %100 = vperm.xlu0 %1385, %v97_v5   ;;  %v1258_v22 = vld [vmem:[%s2069_s0 + $0x184] sm:$0xf0]  ;;  %v1726_v23 = vld [vmem:[%s2070_s1] sm:$0xf]  ;;  %v1347_v27 = vld [vmem:[%s2069_s0 + $0x110] sm:$0xf0]  ;;  %v1257_v29 = vor.u32 %v1361_v18, %v1256_v17 }
  0x14   :  { %v1196_v26 = vld [vmem:[%s2069_s0 + $0xe0] sm:$0xf]  ;;  %v1341_v28 = vld [vmem:[%s2069_s0 + $0xe4] sm:$0xf]  ;;  %v1261_v30 = vor.u32 %v1355_v21, %v1258_v22  ;;  %v1198_v31 = vld [vmem:[%s2069_s0 + $0x114] sm:$0xf0] }
  0x15   :  { %450 = vmatpush.bf16.msra.mxu0 %v1129_v52  ;;  %463 = vmatpush.bf16.msra.mxu1 %v1133_v53  ;;  %v1204_v32 = vld [vmem:[%s2069_s0 + $0xe8] sm:$0xf]  ;;  %v94_v33 = vld [vmem:[%s2069_s0 + $0x1c0] sm:$0xff]  ;;  %v1348_v34 = vld [vmem:[%s2069_s0 + $0x118] sm:$0xf0]  ;;  %v1197_v37 = vor.u32 %v1347_v27, %v1196_v26  ;;  %v1201_v38 = vor.u32 %v1341_v28, %v1198_v31 }
  0x16   :  { %476 = vmatpush.bf16.msra.mxu2 %v1137_v58  ;;  %489 = vmatpush.bf16.msra.mxu3 %v1141_v59  ;;  %v1342_v35 = vld [vmem:[%s2069_s0 + $0xec] sm:$0xf]  ;;  %v1206_v36 = vld [vmem:[%s2069_s0 + $0x11c] sm:$0xf0]  ;;  %v1144_v39 = vld [vmem:[%s2069_s0 + $0x78] sm:$0xf]  ;;  %v278_v42 = vunpack.c.l.b16 %v94_v33  ;;  %v1205_v43 = vor.u32 %v1348_v34, %v1204_v32  ;;  %v279_v47 = vunpack.c.h.b16 %v94_v33 }
  0x17   :  { %v1334_v40 = vld [vmem:[%s2069_s0 + $0xa8] sm:$0xf0]  ;;  %v1328_v41 = vld [vmem:[%s2069_s0 + $0x7c] sm:$0xf]  ;;  %v1209_v44 = vor.u32 %v1342_v35, %v1206_v36  ;;  %v1146_v45 = vld [vmem:[%s2069_s0 + $0xac] sm:$0xf0] }
  0x18   :  { %v1152_v46 = vld [vmem:[%s2069_s0 + $0x80] sm:$0xf]  ;;  %v95_v48 = vld [vmem:[%s2069_s0 + $0x1c8] sm:$0xff]  ;;  %v1335_v49 = vld [vmem:[%s2069_s0 + $0xb0] sm:$0xf0]  ;;  %v1145_v52 = vor.u32 %v1334_v40, %v1144_v39  ;;  %v1149_v53 = vor.u32 %v1328_v41, %v1146_v45  ;;  %v343_v56 = vpack.c.b16 %v278_v42, %v278_v42  ;;  %v344_v0 = vpack.c.b16 %v279_v47, %v279_v47 }
  0x19   :  { %451 = vmatpush.bf16.msra.mxu0 %v1077_v2  ;;  %464 = vmatpush.bf16.msra.mxu1 %v1081_v6  ;;  %v1329_v50 = vld [vmem:[%s2069_s0 + $0x84] sm:$0xf]  ;;  %v1154_v51 = vld [vmem:[%s2069_s0 + $0xb4] sm:$0xf0]  ;;  %v1092_v54 = vld [vmem:[%s2069_s0 + $0x10] sm:$0xf]  ;;  %v280_v57 = vunpack.c.l.b16 %v95_v48  ;;  %v281_v58 = vunpack.c.h.b16 %v95_v48  ;;  %v1153_v59 = vor.u32 %v1335_v49, %v1152_v46 }
  0x1a   :  { %477 = vmatpush.bf16.msra.mxu2 %v1085_v9  ;;  %490 = vmatpush.bf16.msra.mxu3 %v1089_v10  ;;  %v1321_v55 = vld [vmem:[%s2069_s0 + $0x40] sm:$0xf0]  ;;  %v1157_v60 = vor.u32 %v1329_v50, %v1154_v51  ;;  %v1315_v61 = vld [vmem:[%s2069_s0 + $0x14] sm:$0xf]  ;;  %v1094_v62 = vld [vmem:[%s2069_s0 + $0x44] sm:$0xf0] }
  0x1b   :  { %v1100_v63 = vld [vmem:[%s2069_s0 + $0x18] sm:$0xf]  ;;  %v1322_v1 = vld [vmem:[%s2069_s0 + $0x48] sm:$0xf0]  ;;  %v1316_v2 = vld [vmem:[%s2069_s0 + $0x1c] sm:$0xf]  ;;  %v1093_v4 = vor.u32 %v1321_v55, %v1092_v54  ;;  %v1097_v5 = vor.u32 %v1315_v61, %v1094_v62  ;;  %v345_v6 = vpack.c.b16 %v280_v57, %v280_v57  ;;  %v346_v7 = vpack.c.b16 %v281_v58, %v281_v58 }
  0x1c   :  { %1282 = vmatmul.msk.bf16.vlgmr.msra.gmra.mxu0 %vm400_vm1, %v1726_v23  ;;  %1283 = vmatmul.msk.bf16.vlgmr.msra.gmra.mxu1 %vm400_vm1, %v1726_v23  ;;  %v1102_v3 = vld [vmem:[%s2069_s0 + $0x4c] sm:$0xf0]  ;;  %v1101_v8 = vor.u32 %v1322_v1, %v1100_v63  ;;  %v430_v10 = vsel %vm404_vm0, %v343_v56, 0  ;;  %v433_v11 = vsel %vm404_vm0, %v344_v0, 0  ;;  %v1264_v12 = vld [vmem:[%s2069_s0 + $0x158] sm:$0xf] }
  0x1d   :  { %499 = vmatpush.bf16.msrb.mxu0 %v418_v15  ;;  %512 = vmatpush.bf16.msrb.mxu1 %v421_v16  ;;  %v1105_v9 = vor.u32 %v1316_v2, %v1102_v3  ;;  %v1362_v13 = vld [vmem:[%s2069_s0 + $0x188] sm:$0xf0]  ;;  %v1356_v14 = vld [vmem:[%s2069_s0 + $0x15c] sm:$0xf] }
  0x1e   :  { %525 = vmatpush.bf16.msrb.mxu2 %v424_v19  ;;  %538 = vmatpush.bf16.msrb.mxu3 %v427_v20 }
  0x1f   :  { %1284 = vmatmul.msk.bf16.vlgmr.msra.gmra.mxu2 %vm400_vm1, %v1726_v23  ;;  %1285 = vmatmul.msk.bf16.vlgmr.msra.gmra.mxu3 %vm400_vm1, %v1726_v23 }
  0x21   :  { %500 = vmatpush.bf16.msrb.mxu0 %v1249_v24  ;;  %513 = vmatpush.bf16.msrb.mxu1 %v1253_v25 }
  0x22   :  { %526 = vmatpush.bf16.msrb.mxu2 %v1257_v29  ;;  %539 = vmatpush.bf16.msrb.mxu3 %v1261_v30 }
  0x25   :  { %501 = vmatpush.bf16.msrb.mxu0 %v1197_v37  ;;  %514 = vmatpush.bf16.msrb.mxu1 %v1201_v38 }
  0x26   :  { %527 = vmatpush.bf16.msrb.mxu2 %v1205_v43  ;;  %540 = vmatpush.bf16.msrb.mxu3 %v1209_v44 }
  0x29   :  { %502 = vmatpush.bf16.msrb.mxu0 %v1145_v52  ;;  %515 = vmatpush.bf16.msrb.mxu1 %v1149_v53 }
  0x2a   :  { %528 = vmatpush.bf16.msrb.mxu2 %v1153_v59  ;;  %541 = vmatpush.bf16.msrb.mxu3 %v1157_v60 }
  0x2b   :  { %15 = vsyncpa [#allocation4], 0  ;;  %v1266_v15 = vld [vmem:[%s2069_s0 + $0x18c] sm:$0xf0]  ;;  %v1272_v16 = vld [vmem:[%s2069_s0 + $0x160] sm:$0xf]  ;;  %v1265_v22 = vor.u32 %v1362_v13, %v1264_v12 }
  0x2c   :  { %v1363_v17 = vld [vmem:[%s2069_s0 + $0x190] sm:$0xf0]  ;;  %v436_v18 = vsel %vm404_vm0, %v345_v6, 0  ;;  %v439_v19 = vsel %vm404_vm0, %v346_v7, 0  ;;  %v1357_v20 = vld [vmem:[%s2069_s0 + $0x164] sm:$0xf]  ;;  %v1269_v24 = vor.u32 %v1356_v14, %v1266_v15 }
  0x2d   :  { %503 = vmatpush.bf16.msrb.mxu0 %v1093_v4  ;;  %516 = vmatpush.bf16.msrb.mxu1 %v1097_v5  ;;  %v1274_v21 = vld [vmem:[%s2069_s0 + $0x194] sm:$0xf0]  ;;  %v1212_v25 = vld [vmem:[%s2069_s0 + $0xf0] sm:$0xf]  ;;  %v1349_v26 = vld [vmem:[%s2069_s0 + $0x120] sm:$0xf0]  ;;  %v1273_v27 = vor.u32 %v1363_v17, %v1272_v16 }
  0x2e   :  { %529 = vmatpush.bf16.msrb.mxu2 %v1101_v8  ;;  %542 = vmatpush.bf16.msrb.mxu3 %v1105_v9  ;;  %v1277_v28 = vor.u32 %v1357_v20, %v1274_v21  ;;  %v1343_v29 = vld [vmem:[%s2069_s0 + $0xf4] sm:$0xf]  ;;  %v1214_v30 = vld [vmem:[%s2069_s0 + $0x124] sm:$0xf0]  ;;  %v1220_v31 = vld [vmem:[%s2069_s0 + $0xf8] sm:$0xf]  ;;  %v1213_v35 = vor.u32 %v1349_v26, %v1212_v25 }
  0x2f   :  { %v1350_v32 = vld [vmem:[%s2069_s0 + $0x128] sm:$0xf0]  ;;  %v1344_v33 = vld [vmem:[%s2069_s0 + $0xfc] sm:$0xf]  ;;  %v1222_v34 = vld [vmem:[%s2069_s0 + $0x12c] sm:$0xf0]  ;;  %v1217_v36 = vor.u32 %v1343_v29, %v1214_v30 }
  0x30   :  { %1286 = vmatmul.msk.bf16.vlgmr.msrb.gmra.mxu0 %vm400_vm1, %v1726_v23  ;;  %1287 = vmatmul.msk.bf16.vlgmr.msrb.gmra.mxu1 %vm400_vm1, %v1726_v23  ;;  %v1160_v37 = vld [vmem:[%s2069_s0 + $0x88] sm:$0xf]  ;;  %v1336_v38 = vld [vmem:[%s2069_s0 + $0xb8] sm:$0xf0]  ;;  %v96_v39 = vld [vmem:[%s2069_s0 + $0x1d0] sm:$0xf]  ;;  %v1221_v40 = vor.u32 %v1350_v32, %v1220_v31  ;;  %v1225_v41 = vor.u32 %v1344_v33, %v1222_v34 }
  0x31   :  { %551 = vmatpush.bf16.msra.mxu0 %v430_v10  ;;  %564 = vmatpush.bf16.msra.mxu1 %v433_v11  ;;  %v1330_v42 = vld [vmem:[%s2069_s0 + $0x8c] sm:$0xf]  ;;  %v1162_v43 = vld [vmem:[%s2069_s0 + $0xbc] sm:$0xf0]  ;;  %v1168_v44 = vld [vmem:[%s2069_s0 + $0x90] sm:$0xf]  ;;  %v282_v48 = vunpack.c.l.b16 %v96_v39  ;;  %v1161_v49 = vor.u32 %v1336_v38, %v1160_v37 }
  0x32   :  { %577 = vmatpush.bf16.msra.mxu2 %v436_v18  ;;  %590 = vmatpush.bf16.msra.mxu3 %v439_v19  ;;  %v1337_v45 = vld [vmem:[%s2069_s0 + $0xc0] sm:$0xf0]  ;;  %v1331_v46 = vld [vmem:[%s2069_s0 + $0x94] sm:$0xf]  ;;  %v1170_v47 = vld [vmem:[%s2069_s0 + $0xc4] sm:$0xf0]  ;;  %v1165_v50 = vor.u32 %v1330_v42, %v1162_v43 }
  0x33   :  { %1288 = vmatmul.msk.bf16.vlgmr.msrb.gmra.mxu2 %vm400_vm1, %v1726_v23  ;;  %1289 = vmatmul.msk.bf16.vlgmr.msrb.gmra.mxu3 %vm400_vm1, %v1726_v23  ;;  %v1108_v51 = vld [vmem:[%s2069_s0 + $0x20] sm:$0xf]  ;;  %v1323_v52 = vld [vmem:[%s2069_s0 + $0x50] sm:$0xf0]  ;;  %v1169_v53 = vor.u32 %v1337_v45, %v1168_v44  ;;  %v1173_v54 = vor.u32 %v1331_v46, %v1170_v47  ;;  %v1317_v55 = vld [vmem:[%s2069_s0 + $0x24] sm:$0xf]  ;;  %v347_v61 = vpack.c.b16 %v282_v48, %v282_v48 }
  0x34   :  { %v1110_v56 = vld [vmem:[%s2069_s0 + $0x54] sm:$0xf0]  ;;  %v1116_v57 = vld [vmem:[%s2069_s0 + $0x28] sm:$0xf]  ;;  %v1324_v58 = vld [vmem:[%s2069_s0 + $0x58] sm:$0xf0]  ;;  %v1109_v62 = vor.u32 %v1323_v52, %v1108_v51 }
  0x35   :  { %552 = vmatpush.bf16.msra.mxu0 %v1265_v22  ;;  %565 = vmatpush.bf16.msra.mxu1 %v1269_v24  ;;  %v1318_v59 = vld [vmem:[%s2069_s0 + $0x2c] sm:$0xf]  ;;  %v1118_v60 = vld [vmem:[%s2069_s0 + $0x5c] sm:$0xf0]  ;;  %v1113_v63 = vor.u32 %v1317_v55, %v1110_v56  ;;  %v1117_v0 = vor.u32 %v1324_v58, %v1116_v57  ;;  %v442_v2 = vsel %vm404_vm0, %v347_v61, 0  ;;  %s1515_s7 = smov 120  }
  0x36   :  { %578 = vmatpush.bf16.msra.mxu2 %v1273_v27  ;;  %591 = vmatpush.bf16.msra.mxu3 %v1277_v28  ;;  %v1121_v1 = vor.u32 %v1318_v59, %v1118_v60  ;;  %v1280_v3 = vld [vmem:[%s2069_s0 + $0x168] sm:$0xf]  ;;  %v1364_v4 = vld [vmem:[%s2069_s0 + $0x198] sm:$0xf0]  ;;  %v1228_v6 = vld [vmem:[%s2069_s0 + $0x100] sm:$0xf] }
  0x37   :  { %v1281_v5 = vor.u32 %v1364_v4, %v1280_v3  ;;  %v1351_v7 = vld [vmem:[%s2069_s0 + $0x130] sm:$0xf0]  ;;  %v1176_v9 = vld [vmem:[%s2069_s0 + $0x98] sm:$0xf]  ;;  %v1338_v10 = vld [vmem:[%s2069_s0 + $0xc8] sm:$0xf0] }
  0x38   :  { %v1229_v8 = vor.u32 %v1351_v7, %v1228_v6  ;;  %v1177_v11 = vor.u32 %v1338_v10, %v1176_v9  ;;  %v1124_v12 = vld [vmem:[%s2069_s0 + $0x30] sm:$0xf]  ;;  %v1325_v13 = vld [vmem:[%s2069_s0 + $0x60] sm:$0xf0]  ;;  %s1514_s0 = smov 112   ;;  %s1516_s14 = smov 16  }
  0x39   :  { %553 = vmatpush.bf16.msra.mxu0 %v1213_v35  ;;  %566 = vmatpush.bf16.msra.mxu1 %v1217_v36  ;;  %v1125_v14 = vor.u32 %v1325_v13, %v1124_v12  ;;  %vm641_vm2 = vcmask 130048   ;;  %s1517_s15 = smov 96   ;;  %s1518_s16 = smov 52   ;;  %vm731_vm3 = vcmask 556032   ;;  %vm733_vm4 = vcmask 64512  }
  0x3a   :  { %579 = vmatpush.bf16.msra.mxu2 %v1221_v40  ;;  %592 = vmatpush.bf16.msra.mxu3 %v1225_v41  ;;  %s1519_s2 = smov 36   ;;  %s1520_s17 = smov 68   ;;  %vm1993_vm5 = vmneg %vm731_vm3  ;;  %vm1523_vm6 = vmmov 1   ;;  %vm990_vm9 = vcmask 31744   ;;  %vm997_vm10 = vcmask 392192   ;;  %vm1056_vm11 = vcmask 24576  }
  0x3b   :  { %s1521_s18 = smov 104   ;;  %s1522_s19 = smov 8   ;;  %vm1300_vm7 = vmpackc.low %vm1523_vm6, %vm1993_vm5 }
  0x3c   :  { %vm1305_vm8 = vmpackc.low %vm1993_vm5, %vm1993_vm5  ;;  %s1524_s25 = smov 60   ;;  %s1525_s26 = smov 64  }
  0x3d   :  { %554 = vmatpush.bf16.msra.mxu0 %v1161_v49  ;;  %567 = vmatpush.bf16.msra.mxu1 %v1165_v50  ;;  %s1527_s27 = smov 124   ;;  %s1528_s10 = smov 56  }
  0x3e   :  { %580 = vmatpush.bf16.msra.mxu2 %v1169_v53  ;;  %593 = vmatpush.bf16.msra.mxu3 %v1173_v54  ;;  %s1529_s11 = smov 88   ;;  %s1530_s1 = smov 4  }
  0x3f   :  { %s1065_s21 = sshll.u32 %s2077_s8, 4  ;;  %s1066_s21 = int_to_ptr.hbm [resolvable:$true] %s1065_s21 }
  0x41   :  { %555 = vmatpush.bf16.msra.mxu0 %v1109_v62  ;;  %568 = vmatpush.bf16.msra.mxu1 %v1113_v63 }
  0x42   :  { %581 = vmatpush.bf16.msra.mxu2 %v1117_v0  ;;  %594 = vmatpush.bf16.msra.mxu3 %v1121_v1 }
  0x44   :  { %1290 = vmatmul.msk.bf16.vlgmr.msra.gmra.mxu0 %vm400_vm1, %v1726_v23  ;;  %1291 = vmatmul.msk.bf16.vlgmr.msra.gmra.mxu1 %vm400_vm1, %v1726_v23 }
  0x45   :  { %603 = vmatpush.bf16.msrb.mxu0 %v442_v2  ;;  %1292 = vmatmul.msk.bf16.vlgmr.msra.gmra.mxu2 %vm400_vm1, %v1726_v23 }
  0x46   :  { %1293 = vmatmul.msk.bf16.vlgmr.msra.gmra.mxu3 %vm400_vm1, %v1726_v23 }
  0x49   :  { %604 = vmatpush.bf16.msrb.mxu0 %v1281_v5 }
  0x4d   :  { %605 = vmatpush.bf16.msrb.mxu0 %v1229_v8 }
  0x51   :  { %606 = vmatpush.bf16.msrb.mxu0 %v1177_v11 }
  0x55   :  { %607 = vmatpush.bf16.msrb.mxu0 %v1125_v14 }
  0x58   :  { %1294 = vmatmul.msk.bf16.vlgmr.msrb.gmra.mxu0 %vm400_vm1, %v1726_v23 }
  0x85   :  { %v101_v30 = vpop.permute.xlu0 %100 }
  0x99   :  { %v453_v15 = vpop.f32.mrf.mxu0  ;;  %v466_v16 = vpop.f32.mrf.mxu1 }
  0x9a   :  { %v454_v0 = vadd.f32 %v453_v15, %v101_v30  ;;  %v467_v1 = vadd.f32 %v466_v16, %v101_v30 }
  0x9c   :  { %v613_v7 = vmax.f32 %v454_v0, 0.0  ;;  %v614_v8 = vmax.f32 %v467_v1, 0.0 }
  0x9e   :  { %v626_v12 = vmax.f32 %v613_v7, %v614_v8 }
  0xa1   :  { %v455_v19 = vpop.f32.mrf.mxu0  ;;  %v468_v20 = vpop.f32.mrf.mxu1 }
  0xa2   :  { %v479_v17 = vpop.f32.mrf.mxu2  ;;  %v492_v18 = vpop.f32.mrf.mxu3 }
  0xa3   :  { %v493_v31 = vadd.f32 %v492_v18, %v101_v30  ;;  %v480_v33 = vadd.f32 %v479_v17, %v101_v30 }
  0xa5   :  { %v616_v37 = vmax.f32 %v493_v31, 0.0  ;;  %v615_v41 = vmax.f32 %v480_v33, 0.0 }
  0xa7   :  { %v643_v46 = vmax.f32 %v615_v41, %v616_v37  ;;  %v627_v17 = vmax.f32 %v626_v12, %v615_v41 }
  0xaa   :  { %v481_v21 = vpop.f32.mrf.mxu2  ;;  %v494_v22 = vpop.f32.mrf.mxu3 }
  0xad   :  { %v505_v24 = vpop.f32.mrf.mxu0  ;;  %v518_v25 = vpop.f32.mrf.mxu1 }
  0xae   :  { %v506_v34 = vadd.f32 %v505_v24, %v101_v30  ;;  %v519_v47 = vadd.f32 %v518_v25, %v101_v30 }
  0xb0   :  { %v617_v42 = vmax.f32 %v506_v34, 0.0  ;;  %v618_v53 = vmax.f32 %v519_v47, 0.0 }
  0xb2   :  { %v644_v50 = vmax.f32 %v643_v46, %v617_v42  ;;  %v659_v62 = vmax.f32 %v617_v42, %v618_v53 }
  0xb5   :  { %v507_v28 = vpop.f32.mrf.mxu0  ;;  %v520_v29 = vpop.f32.mrf.mxu1 }
  0xb6   :  { %v531_v26 = vpop.f32.mrf.mxu2  ;;  %v544_v27 = vpop.f32.mrf.mxu3 }
  0xb7   :  { %v545_v32 = vadd.f32 %v544_v27, %v101_v30  ;;  %v532_v23 = vadd.f32 %v531_v26, %v101_v30 }
  0xb9   :  { %v620_v38 = vmax.f32 %v545_v32, 0.0  ;;  %v619_v43 = vmax.f32 %v532_v23, 0.0 }
  0xbb   :  { %v675_v48 = vmax.f32 %v619_v43, %v620_v38  ;;  %v660_v2 = vmax.f32 %v659_v62, %v619_v43 }
  0xbe   :  { %v533_v35 = vpop.f32.mrf.mxu2  ;;  %v546_v36 = vpop.f32.mrf.mxu3 }
  0xc1   :  { %v557_v39 = vpop.f32.mrf.mxu0  ;;  %v570_v40 = vpop.f32.mrf.mxu1 }
  0xc2   :  { %v558_v44 = vadd.f32 %v557_v39, %v101_v30  ;;  %v571_v45 = vadd.f32 %v570_v40, %v101_v30 }
  0xc4   :  { %v621_v49 = vmax.f32 %v558_v44, 0.0  ;;  %v622_v52 = vmax.f32 %v571_v45, 0.0 }
  0xc6   :  { %v676_v51 = vmax.f32 %v675_v48, %v621_v49  ;;  %v691_v60 = vmax.f32 %v621_v49, %v622_v52 }
  0xc8   :  { %v583_v54 = vpop.f32.mrf.mxu2  ;;  %v1391_v56 = vpack.i.bf16 %v676_v51, %v644_v50 }
  0xc9   :  { %v596_v55 = vpop.f32.mrf.mxu3  ;;  %v584_v57 = vadd.f32 %v583_v54, %v101_v30  ;;  %v559_v58 = vpop.f32.mrf.mxu0 }
  0xca   :  { %v572_v59 = vpop.f32.mrf.mxu1  ;;  %1392 = vrot.lane.b32.xlu1 %v1391_v56, %s1514_s0  ;;  %1387 = vrot.lane.b32.xlu0 %v1391_v56, %s1515_s7  ;;  %v597_v3 = vadd.f32 %v596_v55, %v101_v30 }
  0xcb   :  { %v623_v61 = vmax.f32 %v584_v57, 0.0 }
  0xcc   :  { %v624_v9 = vmax.f32 %v597_v3, 0.0 }
  0xcd   :  { %v692_v63 = vmax.f32 %v691_v60, %v623_v61 }
  0xce   :  { %v707_v13 = vmax.f32 %v623_v61, %v624_v9 }
  0xcf   :  { %v1411_v5 = vpack.i.bf16 %v692_v63, %v660_v2 }
  0xd0   :  { %v585_v4 = vpop.f32.mrf.mxu2 }
  0xd1   :  { %v598_v6 = vpop.f32.mrf.mxu3 }
  0xd2   :  { %1412 = vrot.lane.b32.xlu0 %v1411_v5, %s1514_s0  ;;  %v828_v6 = vld [vmem:[%s2073_s4 + $0x8] sm:$0xff] }
  0xd5   :  { %v609_v10 = vpop.f32.mrf.mxu0 }
  0xd6   :  { %v610_v11 = vadd.f32 %v609_v10, %v101_v30 }
  0xd8   :  { %v625_v14 = vmax.f32 %v610_v11, 0.0 }
  0xda   :  { %v708_v18 = vmax.f32 %v707_v13, %v625_v14 }
  0xdc   :  { %v1401_v19 = vpack.i.bf16 %v627_v17, %v708_v18 }
  0xdd   :  { %v611_v15 = vpop.f32.mrf.mxu0 }
  0xde   :  { %1402 = vrot.lane.b32.xlu2 %v1401_v19, %s1514_s0  ;;  %1397 = vrot.lane.b32.xlu1 %v1401_v19, %s1515_s7  ;;  %v827_v15 = vld [vmem:[%s2073_s4] sm:$0xff] }
  0xe6   :  { %1407 = vrot.lane.b32.xlu2 %v1411_v5, %s1515_s7 }
 0x138   :  { %v1403_v16 = vpop.permute.xlu2 %1402 }
 0x139   :  { %v1405_v45 = vunpack.i.h.bf16 %v1403_v16  ;;  %v1404_v46 = vunpack.i.l.bf16 %v1403_v16 }
 0x13c   :  { %v1393_v20 = vpop.permute.xlu1 %1392  ;;  %v1388_v21 = vpop.permute.xlu0 %1387 }
 0x13d   :  { %v1390_v22 = vunpack.i.h.bf16 %v1388_v21  ;;  %v1389_v24 = vunpack.i.l.bf16 %v1388_v21  ;;  %v1395_v26 = vunpack.i.h.bf16 %v1393_v20  ;;  %v1394_v27 = vunpack.i.l.bf16 %v1393_v20 }
 0x13f   :  { %v681_v28 = vmax.f32 %v676_v51, %v1390_v22  ;;  %v649_v29 = vmax.f32 %v644_v50, %v1389_v24 }
 0x140   :  { %v1408_v25 = vpop.permute.xlu2 %1407 }
 0x141   :  { %v685_v30 = vmax.f32 %v681_v28, %v1395_v26  ;;  %v653_v31 = vmax.f32 %v649_v29, %v1394_v27  ;;  %v1410_v32 = vunpack.i.h.bf16 %v1408_v25  ;;  %v1409_v33 = vunpack.i.l.bf16 %v1408_v25 }
 0x143   :  { %v1416_v34 = vpack.i.bf16 %v685_v30, %v653_v31  ;;  %v697_v35 = vmax.f32 %v692_v63, %v1410_v32  ;;  %v665_v36 = vmax.f32 %v660_v2, %v1409_v33 }
 0x144   :  { %v1413_v23 = vpop.permute.xlu0 %1412 }
 0x145   :  { %v1415_v37 = vunpack.i.h.bf16 %v1413_v23  ;;  %v1414_v38 = vunpack.i.l.bf16 %v1413_v23  ;;  %1417 = vrot.lane.b32.xlu1 %v1416_v34, %s1516_s14 }
 0x147   :  { %v669_v39 = vmax.f32 %v665_v36, %v1414_v38  ;;  %v701_v40 = vmax.f32 %v697_v35, %v1415_v37 }
 0x149   :  { %v1426_v41 = vpack.i.bf16 %v701_v40, %v669_v39 }
 0x14b   :  { %1427 = vrot.lane.b32.xlu0 %v1426_v41, %s1516_s14 }
 0x150   :  { %v1398_v42 = vpop.permute.xlu1 %1397 }
 0x151   :  { %v1400_v43 = vunpack.i.h.bf16 %v1398_v42  ;;  %v1399_v44 = vunpack.i.l.bf16 %v1398_v42 }
 0x153   :  { %v632_v47 = vmax.f32 %v627_v17, %v1400_v43  ;;  %v713_v48 = vmax.f32 %v708_v18, %v1399_v44 }
 0x155   :  { %v636_v49 = vmax.f32 %v632_v47, %v1405_v45  ;;  %v717_v50 = vmax.f32 %v713_v48, %v1404_v46 }
 0x157   :  { %v1421_v51 = vpack.i.bf16 %v636_v49, %v717_v50 }
 0x159   :  { %1422 = vrot.lane.b32.xlu2 %v1421_v51, %s1516_s14 }
 0x1b3   :  { %v1423_v52 = vpop.permute.xlu2 %1422 }
 0x1b4   :  { %v1425_v53 = vunpack.i.h.bf16 %v1423_v52  ;;  %v1424_v2 = vunpack.i.l.bf16 %v1423_v52 }
 0x1b6   :  { %v1967_v56 = vsel %vm641_vm2, 0.0, %v1425_v53  ;;  %v722_v4 = vsel %vm641_vm2, 0.0, %v1424_v2 }
 0x1b7   :  { %v1418_v54 = vpop.permute.xlu1 %1417 }
 0x1b8   :  { %v1419_v55 = vunpack.i.l.bf16 %v1418_v54  ;;  %v1420_v59 = vunpack.i.h.bf16 %v1418_v54 }
 0x1ba   :  { %v658_v57 = vsel %vm641_vm2, 0.0, %v1419_v55  ;;  %v690_v62 = vsel %vm641_vm2, 0.0, %v1420_v59 }
 0x1bb   :  { %v1436_v58 = vpack.i.bf16 %v1967_v56, %v658_v57 }
 0x1bd   :  { %v1428_v60 = vpop.permute.xlu0 %1427  ;;  %1437 = vrot.lane.b32.xlu2 %v1436_v58, %s1514_s0  ;;  %1432 = vrot.lane.b32.xlu1 %v1436_v58, %s1517_s15 }
 0x1be   :  { %v1429_v61 = vunpack.i.l.bf16 %v1428_v60  ;;  %v1430_v1 = vunpack.i.h.bf16 %v1428_v60 }
 0x1c0   :  { %v674_v63 = vsel %vm641_vm2, 0.0, %v1429_v61  ;;  %v706_v3 = vsel %vm641_vm2, 0.0, %v1430_v1 }
 0x1c1   :  { %v1451_v0 = vpack.i.bf16 %v674_v63, %v690_v62  ;;  %v1456_v5 = vpack.i.bf16 %v706_v3, %v722_v4  ;;  %v1365_v63 = vld [vmem:[%s2072_s3] sm:$0xff]  ;;  %s1526_s3 = smov 28  }
 0x1c3   :  { %1452 = vrot.lane.b32.xlu0 %v1451_v0, %s1518_s16 }
 0x1c5   :  { %1442 = vrot.lane.b32.xlu2 %v1451_v0, %s1519_s2  ;;  %1447 = vrot.lane.b32.xlu1 %v1451_v0, %s1520_s17 }
 0x1cb   :  { %1457 = vrot.lane.b32.xlu0 %v1456_v5, %s1521_s18 }
 0x1cd   :  { %1467 = vrot.lane.b32.xlu2 %v1456_v5, %s1515_s7  ;;  %1462 = vrot.lane.b32.xlu1 %v1456_v5, %s1522_s19 }
 0x1d3   :  { %743 = vrot.lane.b32.xlu0 %v658_v57, %s1519_s2 }
 0x1d5   :  { %724 = vrot.lane.b32.xlu2 %v658_v57, %s1520_s17  ;;  %746 = vrot.lane.b32.xlu1 %v690_v62, %s1521_s18 }
 0x1db   :  { %735 = vrot.lane.b32.xlu0 %v658_v57, %s1518_s16 }
 0x1dd   :  { %738 = vrot.lane.b32.xlu2 %v690_v62, %s1515_s7  ;;  %728 = vrot.lane.b32.xlu1 %v690_v62, %s1522_s19 }
 0x1e3   :  { %836 = vperm.xlu0 %1385, %v828_v6  }
 0x1e5   :  { %831 = vperm.xlu1 %1471, %v827_v15   ;;  %v2032_v15 = vld [vmem:[%s2074_s5 + $0x18] sm:$0xff] }
 0x217   :  { %v1438_v7 = vpop.permute.xlu2 %1437 }
 0x218   :  { %v1439_v16 = vunpack.i.l.bf16 %v1438_v7  ;;  %v1440_v22 = vunpack.i.h.bf16 %v1438_v7 }
 0x21f   :  { %v1443_v8 = vpop.permute.xlu2 %1442 }
 0x220   :  { %v1444_v10 = vunpack.i.l.bf16 %v1443_v8  ;;  %v1445_v29 = vunpack.i.h.bf16 %v1443_v8 }
 0x227   :  { %v1468_v27 = vpop.permute.xlu2 %1467 }
 0x228   :  { %v1469_v40 = vunpack.i.l.bf16 %v1468_v27  ;;  %v1470_v50 = vunpack.i.h.bf16 %v1468_v27 }
 0x22f   :  { %v1433_v9 = vpop.permute.xlu1 %1432  ;;  %v725_v44 = vpop.permute.xlu2 %724 }
 0x230   :  { %v1434_v11 = vunpack.i.l.bf16 %v1433_v9  ;;  %v1435_v24 = vunpack.i.h.bf16 %v1433_v9 }
 0x232   :  { %v813_v12 = vsel %vm731_vm3, %v1434_v11, %v1444_v10  ;;  %v782_v33 = vsel %vm731_vm3, %v1435_v24, %v1445_v29 }
 0x233   :  { %v823_v13 = vpack.c.bf16 %v813_v12, %v813_v12 }
 0x235   :  { %v1453_v14 = vpop.permute.xlu0 %1452  ;;  %v848_v17 = vsel %vm404_vm0, %v823_v13, 0 }
 0x236   :  { %v1454_v18 = vunpack.i.l.bf16 %v1453_v14  ;;  %856 = vmatpush.bf16.msrb.mxu1 %v848_v17  ;;  %v1455_v20 = vunpack.i.h.bf16 %v1453_v14 }
 0x237   :  { %v1448_v19 = vpop.permute.xlu1 %1447  ;;  %v739_v61 = vpop.permute.xlu2 %738 }
 0x238   :  { %v1449_v21 = vunpack.i.l.bf16 %v1448_v19  ;;  %v802_v26 = vsel %vm731_vm3, %v1439_v16, %v1454_v18  ;;  %v771_v30 = vsel %vm731_vm3, %v1440_v22, %v1455_v20  ;;  %v1450_v37 = vunpack.i.h.bf16 %v1448_v19  ;;  %v2027_v19 = vld [vmem:[%s2074_s5 + $0x10] sm:$0xff]  ;;  %v1046_v22 = vld [vmem:[#allocation2] sm:$0x1] }
 0x239   :  { %v819_v23 = vpack.c.bf16 %v782_v33, %v771_v30  ;;  %v803_v47 = vsel %vm733_vm4, %v1454_v18, %v1469_v40  ;;  %v772_v54 = vsel %vm733_vm4, %v1455_v20, %v1470_v50  ;;  %v962_v16 = vmul.f32 %v2027_v19, %v2027_v19 }
 0x23a   :  { %v791_v25 = vsel %vm731_vm3, %v658_v57, %v1449_v21  ;;  %v759_v45 = vsel %vm731_vm3, %v1967_v56, %v1450_v37  ;;  %v963_v20 = vmul.f32 %v2032_v15, %v2032_v15 }
 0x23b   :  { %v821_v28 = vpack.c.bf16 %v802_v26, %v791_v25 }
 0x23d   :  { %857 = vmatpush.bf16.msrb.mxu1 %v821_v28  ;;  %v1458_v31 = vpop.permute.xlu0 %1457 }
 0x23e   :  { %v1459_v32 = vunpack.i.l.bf16 %v1458_v31  ;;  %v1460_v41 = vunpack.i.h.bf16 %v1458_v31 }
 0x23f   :  { %v1463_v34 = vpop.permute.xlu1 %1462 }
 0x240   :  { %v1464_v35 = vunpack.i.l.bf16 %v1463_v34  ;;  %v814_v36 = vsel %vm733_vm4, %v1444_v10, %v1459_v32  ;;  %v783_v52 = vsel %vm733_vm4, %v1445_v29, %v1460_v41  ;;  %v1465_v53 = vunpack.i.h.bf16 %v1463_v34 }
 0x241   :  { %858 = vmatpush.bf16.msrb.mxu1 %v819_v23  ;;  %v824_v38 = vpack.c.bf16 %v814_v36, %v814_v36  ;;  %v820_v55 = vpack.c.bf16 %v783_v52, %v772_v54  ;;  %v953_v36 = vld [vmem:[%s2074_s5] sm:$0xff] }
 0x242   :  { %v792_v43 = vsel %vm733_vm4, %v1449_v21, %v1464_v35  ;;  %v760_v57 = vsel %vm733_vm4, %v1450_v37, %v1465_v53  ;;  %v1477_v21 = vpack.i.bf16 %v962_v16, %v963_v20  ;;  %v954_v37 = vld [vmem:[%s2074_s5 + $0x8] sm:$0xff] }
 0x243   :  { %v851_v42 = vsel %vm404_vm0, %v824_v38, 0  ;;  %v822_v49 = vpack.c.bf16 %v803_v47, %v792_v43  ;;  %v960_v38 = vmul.f32 %v953_v36, %v953_v36  ;;  %v961_v39 = vmul.f32 %v954_v37, %v954_v37 }
 0x244   :  { %870 = vmatpush.bf16.msrb.mxu2 %v851_v42 }
 0x245   :  { %v744_v46 = vpop.permute.xlu0 %743  ;;  %v1482_v42 = vpack.i.bf16 %v960_v38, %v961_v39 }
 0x246   :  { %v1301_v48 = vpack.c.bf16 %v759_v45, %v744_v46 }
 0x247   :  { %v747_v51 = vpop.permute.xlu1 %746 }
 0x248   :  { %1302 = vmatpush.bf16.msk.msrb.mxu1 %vm1300_vm7, %v1301_v48  ;;  %871 = vmatpush.bf16.msrb.mxu2 %v822_v49  ;;  %v750_v56 = vsel %vm733_vm4, %v744_v46, %v747_v51 }
 0x249   :  { %v818_v59 = vpack.c.bf16 %v760_v57, %v750_v56 }
 0x24c   :  { %872 = vmatpush.bf16.msrb.mxu2 %v820_v55 }
 0x24d   :  { %v736_v58 = vpop.permute.xlu0 %735 }
 0x24e   :  { %v1306_v60 = vpack.c.bf16 %v736_v58, %v725_v44  ;;  %v742_v0 = vsel %vm733_vm4, %v736_v58, %v739_v61 }
 0x24f   :  { %v729_v62 = vpop.permute.xlu1 %728 }
 0x250   :  { %v734_v1 = vsel %vm733_vm4, %v725_v44, %v729_v62  ;;  %1307 = vmatpush.bf16.msk.msrb.mxu1 %vm1305_vm8, %v1306_v60  ;;  %873 = vmatpush.bf16.msrb.mxu2 %v818_v59 }
 0x251   :  { %v816_v2 = vpack.c.bf16 %v742_v0, %v734_v1 }
 0x253   :  { %1308 = vmatmul.msk.bf16.vlgmr.msrb.gmra.mxu1 %vm400_vm1, %v1365_v63 }
 0x254   :  { %874 = vmatpush.bf16.msrb.mxu2 %v816_v2 }
 0x255   :  { %v837_v7 = vpop.permute.xlu0 %836 }
 0x257   :  { %1309 = vmatmul.msk.bf16.vlgmr.msrb.gmra.mxu2 %vm400_vm1, %v1365_v63  ;;  %v832_v3 = vpop.permute.xlu1 %831 }
 0x2d0   :  { %v862_v4 = vpop.f32.mrf.mxu1 }
 0x2d1   :  { %v863_v5 = vadd.f32 %v862_v4, %v832_v3 }
 0x2d3   :  { %v881_v6 = vmax.f32 %v863_v5, 0.0 }
 0x2d5   :  { %903 = vrot.lane.b32.xlu1 %v881_v6, %s1524_s25  ;;  %895 = vrot.lane.b32.xlu2 %v881_v6, %s1525_s26 }
 0x2d6   :  { %887 = vrot.lane.b32.xlu0 %v881_v6, %s1517_s15 }
 0x2d8   :  { %v864_v8 = vpop.f32.mrf.mxu1 }
 0x2d9   :  { %v865_v9 = vadd.f32 %v864_v8, %v837_v7 }
 0x2da   :  { %v876_v10 = vpop.f32.mrf.mxu2 }
 0x2db   :  { %v883_v11 = vmax.f32 %v865_v9, 0.0  ;;  %v877_v12 = vadd.f32 %v876_v10, %v832_v3 }
 0x2dd   :  { %897 = vrot.lane.b32.xlu1 %v883_v11, %s1525_s26  ;;  %889 = vrot.lane.b32.xlu2 %v883_v11, %s1517_s15  ;;  %v882_v13 = vmax.f32 %v877_v12, 0.0 }
 0x2de   :  { %911 = vrot.lane.b32.xlu0 %v881_v6, %s1526_s3 }
 0x2e2   :  { %v878_v14 = vpop.f32.mrf.mxu2 }
 0x2e3   :  { %v879_v17 = vadd.f32 %v878_v14, %v837_v7 }
 0x2e5   :  { %913 = vrot.lane.b32.xlu2 %v883_v11, %s1526_s3  ;;  %929 = vrot.lane.b32.xlu1 %v882_v13, %s1515_s7  ;;  %v884_v18 = vmax.f32 %v879_v17, 0.0  ;;  %v958_v17 = vld [vmem:[%s2075_s6 + $0x8] sm:$0xff] }
 0x2e6   :  { %905 = vrot.lane.b32.xlu0 %v883_v11, %s1524_s25 }
 0x2ed   :  { %923 = vrot.lane.b32.xlu1 %v884_v18, %s1527_s27  ;;  %921 = vrot.lane.b32.xlu2 %v882_v13, %s1527_s27 }
 0x2ee   :  { %931 = vrot.lane.b32.xlu0 %v884_v18, %s1515_s7 }
 0x2f5   :  { %947 = vrot.lane.b32.xlu1 %v884_v18, %s1528_s10  ;;  %939 = vrot.lane.b32.xlu2 %v884_v18, %s1529_s11  ;;  %v959_v18 = vld [vmem:[%s2075_s6 + $0x10] sm:$0x1] }
 0x2f6   :  { %937 = vrot.lane.b32.xlu0 %v882_v13, %s1529_s11 }
 0x2fd   :  { %1478 = vrot.lane.b32.xlu1 %v1477_v21, %s1530_s1  ;;  %945 = vrot.lane.b32.xlu2 %v882_v13, %s1528_s10  ;;  %v957_v13 = vld [vmem:[%s2075_s6] sm:$0xff]  ;;  %s1531_s6 = smov [#allocation3]  }
 0x2fe   :  { %s1063_s18 = sshll.u32 %s1531_s6, 4  ;;  %s1064_s18 = int_to_ptr.vmem [resolvable:$true] %s1063_s18 }
 0x305   :  { %1049 = vperm.xlu1 %1471, %v1046_v22   ;;  %1483 = vrot.lane.b32.xlu2 %v1482_v42, %s1530_s1 }
 0x32f   :  { %v896_v24 = vpop.permute.xlu2 %895 }
 0x337   :  { %v890_v25 = vpop.permute.xlu2 %889 }
 0x338   :  { %v894_v31 = vmax.f32 %v883_v11, %v890_v25 }
 0x33f   :  { %v914_v28 = vpop.permute.xlu2 %913 }
 0x347   :  { %v904_v26 = vpop.permute.xlu1 %903  ;;  %v922_v32 = vpop.permute.xlu2 %921 }
 0x348   :  { %v888_v27 = vpop.permute.xlu0 %887 }
 0x349   :  { %v893_v33 = vmax.f32 %v881_v6, %v888_v27 }
 0x34b   :  { %v901_v41 = vmax.f32 %v893_v33, %v896_v24 }
 0x34d   :  { %v909_v44 = vmax.f32 %v901_v41, %v904_v26 }
 0x34f   :  { %v898_v29 = vpop.permute.xlu1 %897  ;;  %v940_v46 = vpop.permute.xlu2 %939 }
 0x350   :  { %v912_v30 = vpop.permute.xlu0 %911  ;;  %v902_v23 = vmax.f32 %v894_v31, %v898_v29 }
 0x351   :  { %v917_v49 = vmax.f32 %v909_v44, %v912_v30 }
 0x353   :  { %v927_v51 = vmax.f32 %v917_v49, %v922_v32 }
 0x357   :  { %v930_v34 = vpop.permute.xlu1 %929  ;;  %v946_v58 = vpop.permute.xlu2 %945 }
 0x358   :  { %v906_v35 = vpop.permute.xlu0 %905  ;;  %v935_v52 = vmax.f32 %v927_v51, %v930_v34 }
 0x359   :  { %v910_v40 = vmax.f32 %v902_v23, %v906_v35 }
 0x35b   :  { %v918_v43 = vmax.f32 %v910_v40, %v914_v28 }
 0x35f   :  { %v924_v45 = vpop.permute.xlu1 %923  ;;  %v1484_v4 = vpop.permute.xlu2 %1483 }
 0x360   :  { %v932_v47 = vpop.permute.xlu0 %931  ;;  %v928_v48 = vmax.f32 %v918_v43, %v924_v45  ;;  %v1485_v9 = vunpack.i.l.bf16 %v1484_v4  ;;  %v1486_v10 = vunpack.i.h.bf16 %v1484_v4 }
 0x362   :  { %v936_v50 = vmax.f32 %v928_v48, %v932_v47  ;;  %v992_v12 = vsel %vm990_vm9, %v954_v37, %v1485_v9  ;;  %v991_v14 = vsel %vm990_vm9, %v953_v36, %v1486_v10 }
 0x364   :  { %v944_v54 = vmax.f32 %v936_v50, %v940_v46 }
 0x367   :  { %v948_v53 = vpop.permute.xlu1 %947 }
 0x368   :  { %v938_v55 = vpop.permute.xlu0 %937  ;;  %v952_v57 = vmax.f32 %v944_v54, %v948_v53 }
 0x369   :  { %v943_v56 = vmax.f32 %v935_v52, %v938_v55 }
 0x36a   :  { %v965_v61 = vmul.f32 %v952_v57, %v952_v57 }
 0x36b   :  { %v951_v59 = vmax.f32 %v943_v56, %v946_v58 }
 0x36d   :  { %v964_v60 = vmul.f32 %v951_v59, %v951_v59 }
 0x36f   :  { %v1472_v62 = vpack.i.bf16 %v964_v60, %v965_v61  ;;  %v1479_v63 = vpop.permute.xlu1 %1478 }
 0x370   :  { %v1480_v1 = vunpack.i.l.bf16 %v1479_v63  ;;  %v1481_v6 = vunpack.i.h.bf16 %v1479_v63 }
 0x371   :  { %1473 = vrot.lane.b32.xlu0 %v1472_v62, %s1530_s1 }
 0x372   :  { %v994_v8 = vsel %vm990_vm9, %v2032_v15, %v1480_v1  ;;  %v993_v11 = vsel %vm990_vm9, %v2027_v19, %v1481_v6 }
 0x377   :  { %v1050_v28 = vpop.permute.xlu1 %1049 }
 0x378   :  { %v1052_v31 = vperm.slane %v1050_v28, 0 }
 0x3e3   :  { %v1474_v0 = vpop.permute.xlu0 %1473 }
 0x3e4   :  { %v1476_v2 = vunpack.i.h.bf16 %v1474_v0  ;;  %v1475_v3 = vunpack.i.l.bf16 %v1474_v0 }
 0x3e6   :  { %v996_v5 = vsel %vm990_vm9, %v952_v57, %v1475_v3  ;;  %v995_v7 = vsel %vm990_vm9, %v951_v59, %v1476_v2 }
 0x3e7   :  { %1017 = vmatpush.msrb.mxu3 %v996_v5 }
 0x3e9   :  { %1018 = vmatpush.msrb.mxu3 %v995_v7 }
 0x3eb   :  { %1019 = vmatpush.msrb.mxu3 %v994_v8 }
 0x3ed   :  { %1020 = vmatpush.msrb.mxu3 %v993_v11 }
 0x3ef   :  { %1021 = vmatpush.msrb.mxu3 %v992_v12 }
 0x3f1   :  { %1022 = vmatpush.msrb.mxu3 %v991_v14 }
 0x3f2   :  { %1310 = vmatmul.msk.f32.vlgmr.msrb.gmra.mxu3 %vm997_vm10, %v957_v13 }
 0x3fa   :  { %1311 = vmatmul.msk.f32.gmra.mxu3 %vm997_vm10, %v958_v17 }
 0x402   :  { %1312 = vmatmul.msk.f32.gmra.mxu3 %vm997_vm10, %v959_v18 }
 0x475   :  { %v1024_v19 = vpop.f32.mrf.mxu3 }
 0x476   :  { %v1033_v16 = vmul.f32 %v1024_v19, %v1024_v19 }
 0x47d   :  { %v1027_v15 = vpop.f32.mrf.mxu3 }
 0x47e   :  { %1035 = vrot.lane.b32.xlu0 %v1027_v15, %s1527_s27 }
 0x485   :  { %v1030_v30 = vpop.f32.mrf.mxu3 }
 0x486   :  { %v1053_v33 = vadd.f32 %v1052_v31, %v1030_v30 }
 0x4f0   :  { %v1036_v20 = vpop.permute.xlu0 %1035 }
 0x4f1   :  { %v1038_v21 = vsub.f32 %v1033_v16, %v1036_v20 }
 0x4f3   :  { %v1039_v22 = vsel %vm990_vm9, %v1038_v21, 0.0 }
 0x4f4   :  { %v1040_v24 = vrot.slane %v1039_v22, 4 }
 0x4f6   :  { %v1041_v25 = vadd.f32 %v1040_v24, %v1039_v22 }
 0x4f8   :  { %v1042_v26 = vrot.slane %v1041_v25, 2 }
 0x4fa   :  { %v1043_v27 = vadd.f32 %v1042_v26, %v1041_v25 }
 0x4fc   :  { %v1044_v29 = vrot.slane %v1043_v27, 1 }
 0x4fe   :  { %v1045_v32 = vadd.f32 %v1044_v29, %v1043_v27 }
 0x500   :  { %v1054_v34 = vmul.f32 0.5, %v1045_v32 }
 0x502   :  { %v1055_v23 = vadd.f32 %v1054_v34, %v1053_v33 }
 0x504   :  { %1057 = vst.msk [vmem:[#allocation3] sm:$0x1] %vm1056_vm11, %v1055_v23 }
 0x505   :  { %1068 = dma.vmem_to_hbm [thread:$0]  %s1064_s18, 16, %s1066_s21, [#allocation4]  }
 0x506   :  { %1511 = dma.done.wait [#allocation4], 16  }
 0x507   :  { %1512 = vsyncadd [#allocation4], 4294967280 }
 0x508   :  { %1073 = vsyncpa [#allocation4], 1 }

</bundles_post_ra>
